<compile_context>
chip_gen: v7x
topology: tpu7x:2x2x1
jax: 0.10.0
libtpu: 0.0.40
codegen_flags: <defaults>
</compile_context>

<pallas_src>
import math

import jax
import jax.numpy as jnp
from jax.experimental import pallas as pl
from jax.experimental.pallas import tpu as pltpu

CH = 128          # hidden / temb channels
HALF = CH // 2    # 64 sinusoid frequencies
W_COLS = 7 * CH   # packed weight slab width  (wd0|wd1|tpw(3)|w2|w3)
MISC_COLS = 13 * CH  # packed misc row width


def _silu(z):
    return z * jax.nn.sigmoid(z)


def _round_up(n, m):
    return ((n + m - 1) // m) * m


def toy_temb_kernel(t_ref, x_ref, wbig_ref, misc_ref, o_ref):
    f32 = jnp.float32

    # ---- unpack the misc row (static, 128-lane-aligned slices -> free views) ----
    freq2 = misc_ref[:, 0 * CH:1 * CH]        # (1,128)  [freqs, freqs]
    w1r0 = misc_ref[:, 1 * CH:2 * CH]         # (1,128)  lin1 weight row for x[:,0]
    w1r1 = misc_ref[:, 2 * CH:3 * CH]         # (1,128)  lin1 weight row for x[:,1]
    b1 = misc_ref[:, 3 * CH:4 * CH]
    bd0 = misc_ref[:, 4 * CH:5 * CH]
    bd1 = misc_ref[:, 5 * CH:6 * CH]
    tpb = misc_ref[:, 6 * CH:9 * CH]          # (1,384)  [tp1b|tp2b|tp3b]
    b2 = misc_ref[:, 9 * CH:10 * CH]
    b3 = misc_ref[:, 10 * CH:11 * CH]
    w4r = misc_ref[:, 11 * CH:12 * CH]        # (1,128)  lin4 weight column (transposed)
    b4 = misc_ref[:, 12 * CH:13 * CH][:, 0:1]  # (1,1)   lin4 bias (replicated chunk)

    # ---- sinusoidal timestep embedding, built in-kernel ----
    t = t_ref[...]                            # (TB, 1)
    e = t * freq2                             # (TB, 128)  t * freqs[lane mod 64]
    lane = jax.lax.broadcasted_iota(jnp.int32, (1, CH), 1)
    temb = jnp.where(lane < HALF, jnp.sin(e), jnp.cos(e))   # concat(sin, cos) equivalent

    # ---- temb MLP: dense0 -> SiLU -> dense1 -> SiLU ----
    temb = jnp.dot(temb, wbig_ref[:, 0:CH], preferred_element_type=f32) + bd0
    temb = _silu(temb)
    temb = jnp.dot(temb, wbig_ref[:, CH:2 * CH], preferred_element_type=f32) + bd1
    a = _silu(temb)                           # act(temb), shared by all temb projections

    # ---- fused temb projections: one (TB,128)x(128,384) matmul, split with lane slices ----
    p = jnp.dot(a, wbig_ref[:, 2 * CH:5 * CH], preferred_element_type=f32) + tpb
    p1 = p[:, 0:CH]
    p2 = p[:, CH:2 * CH]
    p3 = p[:, 2 * CH:3 * CH]

    # ---- lin1 (in_features = 2) on the VPU: no zero-padded MXU pass ----
    x = x_ref[...]                            # (TB, 2)
    h = x[:, 0:1] * w1r0 + x[:, 1:2] * w1r1 + b1
    h = _silu(h * p1)

    # ---- trunk ----
    h = _silu(jnp.dot(h, wbig_ref[:, 5 * CH:6 * CH], preferred_element_type=f32) + b2) * p2
    h = _silu(jnp.dot(h, wbig_ref[:, 6 * CH:7 * CH], preferred_element_type=f32) + b3) * p3

    # ---- lin4 (out_features = 1) as VPU multiply + lane reduce ----
    o_ref[...] = jnp.sum(h * w4r, axis=-1, keepdims=True) + b4


def make_params(key):
    """Deterministic parameter init (uniform(-1/sqrt(fan_in), 1/sqrt(fan_in)), PyTorch-style)."""
    def linear(key, fan_in, fan_out):
        kw, kb = jax.random.split(key)
        bound = 1.0 / math.sqrt(fan_in)
        w = jax.random.uniform(kw, (fan_in, fan_out), jnp.float32, -bound, bound)
        b = jax.random.uniform(kb, (fan_out,), jnp.float32, -bound, bound)
        return w, b

    keys = jax.random.split(key, 9)
    p = {}
    p["wd0"], p["bd0"] = linear(keys[0], CH, CH)      # temb.dense[0]
    p["wd1"], p["bd1"] = linear(keys[1], CH, CH)      # temb.dense[1]
    p["w1"], p["b1"] = linear(keys[2], 2, CH)         # lin1
    p["w2"], p["b2"] = linear(keys[3], CH, CH)        # lin2
    p["w3"], p["b3"] = linear(keys[4], CH, CH)        # lin3
    p["w4"], p["b4"] = linear(keys[5], CH, 1)         # lin4
    p["tp1w"], p["tp1b"] = linear(keys[6], CH, CH)    # temb_proj1
    p["tp2w"], p["tp2b"] = linear(keys[7], CH, CH)    # temb_proj2
    p["tp3w"], p["tp3b"] = linear(keys[8], CH, CH)    # temb_proj3
    return p


def pack_params(params):
    """One-time packing of all weights/biases into two contiguous slabs (no per-call pads)."""
    wbig = jnp.concatenate(
        [params["wd0"], params["wd1"],
         params["tp1w"], params["tp2w"], params["tp3w"],
         params["w2"], params["w3"]],
        axis=1,
    ).astype(jnp.float32)                              # (128, 896)

    emb_scale = math.log(10000.0) / (HALF - 1)
    freqs = jnp.exp(jnp.arange(HALF, dtype=jnp.float32) * -emb_scale)     # (64,)
    freq2 = jnp.concatenate([freqs, freqs])                               # (128,)

    b4_chunk = jnp.full((CH,), params["b4"][0], jnp.float32)              # b4 replicated

    misc = jnp.concatenate(
        [freq2,
         params["w1"][0], params["w1"][1], params["b1"],
         params["bd0"], params["bd1"],
         params["tp1b"], params["tp2b"], params["tp3b"],
         params["b2"], params["b3"],
         params["w4"][:, 0], b4_chunk]
    ).astype(jnp.float32).reshape(1, MISC_COLS)        # (1, 1664)

    return {"wbig": wbig, "misc": misc}


def toy_temb_forward(packed, x, t, *, block_b=256):
    """Pallas implementation of ToyTembModel.forward.

    x: (B, 2), t: (B,) ints.  Returns (B,).
    block_b: batch tile (use 256 on v6e/v7x, 128 on v5e).
    """
    B = x.shape[0]
    TB = int(min(block_b, _round_up(B, 8)))
    Bp = _round_up(B, TB)

    xf = x.astype(jnp.float32)
    tf = t.astype(jnp.float32).reshape(B, 1)
    if Bp != B:
        xf = jnp.pad(xf, ((0, Bp - B), (0, 0)))
        tf = jnp.pad(tf, ((0, Bp - B), (0, 0)))

    out = pl.pallas_call(
        toy_temb_kernel,
        out_shape=jax.ShapeDtypeStruct((Bp, 1), jnp.float32),
        grid=(Bp // TB,),
        in_specs=[
            pl.BlockSpec((TB, 1), lambda i: (i, 0)),           # t
            pl.BlockSpec((TB, 2), lambda i: (i, 0)),           # x
            pl.BlockSpec((CH, W_COLS), lambda i: (0, 0)),      # packed weights (VMEM-resident)
            pl.BlockSpec((1, MISC_COLS), lambda i: (0, 0)),    # packed misc row (VMEM-resident)
        ],
        out_specs=pl.BlockSpec((TB, 1), lambda i: (i, 0)),
        compiler_params=pltpu.CompilerParams(dimension_semantics=("parallel",)),
    )(tf, xf, packed["wbig"], packed["misc"])

    return out[:B, 0]


def toy_temb_reference(params, x, t):
    """Pure-JAX reference of the PyTorch forward, for validation."""
    silu = jax.nn.silu
    emb_scale = math.log(10000.0) / (HALF - 1)
    freqs = jnp.exp(jnp.arange(HALF, dtype=jnp.float32) * -emb_scale)
    e = t.astype(jnp.float32)[:, None] * freqs[None, :]
    temb = jnp.concatenate([jnp.sin(e), jnp.cos(e)], axis=-1)
    temb = temb @ params["wd0"] + params["bd0"]
    temb = silu(temb)
    temb = temb @ params["wd1"] + params["bd1"]
    a = silu(temb)
    h = silu((x @ params["w1"] + params["b1"]) * (a @ params["tp1w"] + params["tp1b"]))
    h = silu(h @ params["w2"] + params["b2"]) * (a @ params["tp2w"] + params["tp2b"])
    h = silu(h @ params["w3"] + params["b3"]) * (a @ params["tp3w"] + params["tp3b"])
    return (h @ params["w4"] + params["b4"])[:, 0]


if __name__ == "__main__":
    key = jax.random.PRNGKey(0)
    kp, kx, kx2 = jax.random.split(key, 3)

    params = make_params(kp)
    packed = pack_params(params)   # packed once, reused for every forward call

    # Case 1: small batch, single grid step.
    B = 8
    x = jax.random.normal(kx, (B, 2), jnp.float32)
    t = jnp.arange(B, dtype=jnp.int32)
    y = jax.block_until_ready(toy_temb_forward(packed, x, t))
    y_ref = toy_temb_reference(params, x, t)
    assert y.shape == (B,)
    assert jnp.allclose(y, y_ref, atol=1e-4, rtol=1e-4), (y, y_ref)

    # Case 2: batch not a multiple of the tile -> exercises the batch grid + padding path.
    B2 = 40
    x2 = jax.random.normal(kx2, (B2, 2), jnp.float32)
    t2 = jnp.arange(B2, dtype=jnp.int32) % 7
    y2 = jax.block_until_ready(toy_temb_forward(packed, x2, t2, block_b=16))
    y2_ref = toy_temb_reference(params, x2, t2)
    assert y2.shape == (B2,)
    assert jnp.allclose(y2, y2_ref, atol=1e-4, rtol=1e-4), (y2, y2_ref)

    print("KERNEL_OK")
</pallas_src>

<mosaic_0001>
module attributes {stable_mosaic.version = 11 : i64} {
  func.func @toy_temb_kernel(%arg0: i32, %arg1: memref<8x1xf32, #tpu.memory_space<vmem>>, %arg2: memref<8x2xf32, #tpu.memory_space<vmem>>, %arg3: memref<128x896xf32, #tpu.memory_space<vmem>>, %arg4: memref<1x1664xf32, #tpu.memory_space<vmem>>, %arg5: memref<8x1xf32, #tpu.memory_space<vmem>>) attributes {dimension_semantics = [#tpu.dimension_semantics<parallel>], iteration_bounds = array<i64: 1>, scalar_prefetch = 0 : i64, scratch_operands = 0 : i64, tpu.core_type = #tpu.core_type<tc>, window_params = [{transform_indices = @transform_0, window_bounds = array<i64: 8, 1>}, {transform_indices = @transform_1, window_bounds = array<i64: 8, 2>}, {pipeline_mode = #tpu.pipeline_mode<synchronous>, transform_indices = @transform_2, window_bounds = array<i64: 128, 896>}, {pipeline_mode = #tpu.pipeline_mode<synchronous>, transform_indices = @transform_3, window_bounds = array<i64: 1, 1664>}, {transform_indices = @transform_4, window_bounds = array<i64: 8, 1>}]} {
    %c0 = arith.constant 0 : index
    %c0_0 = arith.constant 0 : index
    %0 = vector.load %arg4[%c0, %c0_0] : memref<1x1664xf32, #tpu.memory_space<vmem>>, vector<1x128xf32>
    %c0_1 = arith.constant 0 : index
    %c128 = arith.constant 128 : index
    %1 = vector.load %arg4[%c0_1, %c128] : memref<1x1664xf32, #tpu.memory_space<vmem>>, vector<1x128xf32>
    %c0_2 = arith.constant 0 : index
    %c256 = arith.constant 256 : index
    %2 = vector.load %arg4[%c0_2, %c256] : memref<1x1664xf32, #tpu.memory_space<vmem>>, vector<1x128xf32>
    %c0_3 = arith.constant 0 : index
    %c384 = arith.constant 384 : index
    %3 = vector.load %arg4[%c0_3, %c384] : memref<1x1664xf32, #tpu.memory_space<vmem>>, vector<1x128xf32>
    %c0_4 = arith.constant 0 : index
    %c512 = arith.constant 512 : index
    %4 = vector.load %arg4[%c0_4, %c512] : memref<1x1664xf32, #tpu.memory_space<vmem>>, vector<1x128xf32>
    %c0_5 = arith.constant 0 : index
    %c640 = arith.constant 640 : index
    %5 = vector.load %arg4[%c0_5, %c640] : memref<1x1664xf32, #tpu.memory_space<vmem>>, vector<1x128xf32>
    %c0_6 = arith.constant 0 : index
    %c768 = arith.constant 768 : index
    %6 = vector.load %arg4[%c0_6, %c768] : memref<1x1664xf32, #tpu.memory_space<vmem>>, vector<1x384xf32>
    %c0_7 = arith.constant 0 : index
    %c1152 = arith.constant 1152 : index
    %7 = vector.load %arg4[%c0_7, %c1152] : memref<1x1664xf32, #tpu.memory_space<vmem>>, vector<1x128xf32>
    %c0_8 = arith.constant 0 : index
    %c1280 = arith.constant 1280 : index
    %8 = vector.load %arg4[%c0_8, %c1280] : memref<1x1664xf32, #tpu.memory_space<vmem>>, vector<1x128xf32>
    %c0_9 = arith.constant 0 : index
    %c1408 = arith.constant 1408 : index
    %9 = vector.load %arg4[%c0_9, %c1408] : memref<1x1664xf32, #tpu.memory_space<vmem>>, vector<1x128xf32>
    %c0_10 = arith.constant 0 : index
    %c1536 = arith.constant 1536 : index
    %10 = vector.load %arg4[%c0_10, %c1536] : memref<1x1664xf32, #tpu.memory_space<vmem>>, vector<1x128xf32>
    %11 = vector.extract_strided_slice %10 {offsets = [0, 0], sizes = [1, 1], strides = [1, 1]} : vector<1x128xf32> to vector<1x1xf32>
    %c0_11 = arith.constant 0 : index
    %c0_12 = arith.constant 0 : index
    %12 = vector.load %arg1[%c0_11, %c0_12] : memref<8x1xf32, #tpu.memory_space<vmem>>, vector<8x1xf32>
    %13 = vector.broadcast %12 : vector<8x1xf32> to vector<8x128xf32>
    %14 = vector.broadcast %0 : vector<1x128xf32> to vector<8x128xf32>
    %15 = arith.mulf %13, %14 : vector<8x128xf32>
    %16 = tpu.iota {dimensions = array<i32: 1>} : vector<1x128xi32>
    %c64_i32 = arith.constant 64 : i32
    %17 = vector.broadcast %c64_i32 : i32 to vector<1x128xi32>
    %18 = arith.cmpi slt, %16, %17 : vector<1x128xi32>
    %19 = math.sin %15 : vector<8x128xf32>
    %20 = math.cos %15 : vector<8x128xf32>
    %21 = vector.shape_cast %18 : vector<1x128xi1> to vector<1x128xi1>
    %22 = vector.broadcast %21 : vector<1x128xi1> to vector<8x128xi1>
    %23 = arith.select %22, %19, %20 : vector<8x128xi1>, vector<8x128xf32>
    %c0_13 = arith.constant 0 : index
    %c0_14 = arith.constant 0 : index
    %24 = vector.load %arg3[%c0_13, %c0_14] : memref<128x896xf32, #tpu.memory_space<vmem>>, vector<128x128xf32>
    %cst = arith.constant dense<0.000000e+00> : vector<8x128xf32>
    %25 = tpu.matmul %23, %24, %cst {dimension_numbers = #tpu.dot_dimension_numbers<[1], [0], [0], [1], [0, 0, 1, 1], [], []>} : vector<8x128xf32>, vector<128x128xf32>, vector<8x128xf32> -> vector<8x128xf32>
    %26 = vector.broadcast %4 : vector<1x128xf32> to vector<8x128xf32>
    %27 = arith.addf %25, %26 : vector<8x128xf32>
    %28 = arith.negf %27 : vector<8x128xf32>
    %29 = math.exp %28 : vector<8x128xf32>
    %cst_15 = arith.constant 1.000000e+00 : f32
    %30 = vector.broadcast %cst_15 : f32 to vector<8x128xf32>
    %31 = arith.addf %30, %29 : vector<8x128xf32>
    %32 = arith.divf %30, %31 : vector<8x128xf32>
    %33 = arith.mulf %27, %32 : vector<8x128xf32>
    %c0_16 = arith.constant 0 : index
    %c128_17 = arith.constant 128 : index
    %34 = vector.load %arg3[%c0_16, %c128_17] : memref<128x896xf32, #tpu.memory_space<vmem>>, vector<128x128xf32>
    %cst_18 = arith.constant dense<0.000000e+00> : vector<8x128xf32>
    %35 = tpu.matmul %33, %34, %cst_18 {dimension_numbers = #tpu.dot_dimension_numbers<[1], [0], [0], [1], [0, 0, 1, 1], [], []>} : vector<8x128xf32>, vector<128x128xf32>, vector<8x128xf32> -> vector<8x128xf32>
    %36 = vector.broadcast %5 : vector<1x128xf32> to vector<8x128xf32>
    %37 = arith.addf %35, %36 : vector<8x128xf32>
    %38 = arith.negf %37 : vector<8x128xf32>
    %39 = math.exp %38 : vector<8x128xf32>
    %cst_19 = arith.constant 1.000000e+00 : f32
    %40 = vector.broadcast %cst_19 : f32 to vector<8x128xf32>
    %41 = arith.addf %40, %39 : vector<8x128xf32>
    %42 = arith.divf %40, %41 : vector<8x128xf32>
    %43 = arith.mulf %37, %42 : vector<8x128xf32>
    %c0_20 = arith.constant 0 : index
    %c256_21 = arith.constant 256 : index
    %44 = vector.load %arg3[%c0_20, %c256_21] : memref<128x896xf32, #tpu.memory_space<vmem>>, vector<128x384xf32>
    %cst_22 = arith.constant dense<0.000000e+00> : vector<8x384xf32>
    %45 = tpu.matmul %43, %44, %cst_22 {dimension_numbers = #tpu.dot_dimension_numbers<[1], [0], [0], [1], [0, 0, 1, 1], [], []>} : vector<8x128xf32>, vector<128x384xf32>, vector<8x384xf32> -> vector<8x384xf32>
    %46 = vector.broadcast %6 : vector<1x384xf32> to vector<8x384xf32>
    %47 = arith.addf %45, %46 : vector<8x384xf32>
    %48 = vector.extract_strided_slice %47 {offsets = [0, 0], sizes = [8, 128], strides = [1, 1]} : vector<8x384xf32> to vector<8x128xf32>
    %49 = vector.extract_strided_slice %47 {offsets = [0, 128], sizes = [8, 128], strides = [1, 1]} : vector<8x384xf32> to vector<8x128xf32>
    %50 = vector.extract_strided_slice %47 {offsets = [0, 256], sizes = [8, 128], strides = [1, 1]} : vector<8x384xf32> to vector<8x128xf32>
    %c0_23 = arith.constant 0 : index
    %c0_24 = arith.constant 0 : index
    %51 = vector.load %arg2[%c0_23, %c0_24] : memref<8x2xf32, #tpu.memory_space<vmem>>, vector<8x2xf32>
    %52 = vector.extract_strided_slice %51 {offsets = [0, 0], sizes = [8, 1], strides = [1, 1]} : vector<8x2xf32> to vector<8x1xf32>
    %53 = vector.broadcast %52 : vector<8x1xf32> to vector<8x128xf32>
    %54 = vector.broadcast %1 : vector<1x128xf32> to vector<8x128xf32>
    %55 = arith.mulf %53, %54 : vector<8x128xf32>
    %56 = vector.extract_strided_slice %51 {offsets = [0, 1], sizes = [8, 1], strides = [1, 1]} : vector<8x2xf32> to vector<8x1xf32>
    %57 = vector.broadcast %56 : vector<8x1xf32> to vector<8x128xf32>
    %58 = vector.broadcast %2 : vector<1x128xf32> to vector<8x128xf32>
    %59 = arith.mulf %57, %58 : vector<8x128xf32>
    %60 = arith.addf %55, %59 : vector<8x128xf32>
    %61 = vector.broadcast %3 : vector<1x128xf32> to vector<8x128xf32>
    %62 = arith.addf %60, %61 : vector<8x128xf32>
    %63 = arith.mulf %62, %48 : vector<8x128xf32>
    %64 = arith.negf %63 : vector<8x128xf32>
    %65 = math.exp %64 : vector<8x128xf32>
    %cst_25 = arith.constant 1.000000e+00 : f32
    %66 = vector.broadcast %cst_25 : f32 to vector<8x128xf32>
    %67 = arith.addf %66, %65 : vector<8x128xf32>
    %68 = arith.divf %66, %67 : vector<8x128xf32>
    %69 = arith.mulf %63, %68 : vector<8x128xf32>
    %c0_26 = arith.constant 0 : index
    %c640_27 = arith.constant 640 : index
    %70 = vector.load %arg3[%c0_26, %c640_27] : memref<128x896xf32, #tpu.memory_space<vmem>>, vector<128x128xf32>
    %cst_28 = arith.constant dense<0.000000e+00> : vector<8x128xf32>
    %71 = tpu.matmul %69, %70, %cst_28 {dimension_numbers = #tpu.dot_dimension_numbers<[1], [0], [0], [1], [0, 0, 1, 1], [], []>} : vector<8x128xf32>, vector<128x128xf32>, vector<8x128xf32> -> vector<8x128xf32>
    %72 = vector.broadcast %7 : vector<1x128xf32> to vector<8x128xf32>
    %73 = arith.addf %71, %72 : vector<8x128xf32>
    %74 = arith.negf %73 : vector<8x128xf32>
    %75 = math.exp %74 : vector<8x128xf32>
    %cst_29 = arith.constant 1.000000e+00 : f32
    %76 = vector.broadcast %cst_29 : f32 to vector<8x128xf32>
    %77 = arith.addf %76, %75 : vector<8x128xf32>
    %78 = arith.divf %76, %77 : vector<8x128xf32>
    %79 = arith.mulf %73, %78 : vector<8x128xf32>
    %80 = arith.mulf %79, %49 : vector<8x128xf32>
    %c0_30 = arith.constant 0 : index
    %c768_31 = arith.constant 768 : index
    %81 = vector.load %arg3[%c0_30, %c768_31] : memref<128x896xf32, #tpu.memory_space<vmem>>, vector<128x128xf32>
    %cst_32 = arith.constant dense<0.000000e+00> : vector<8x128xf32>
    %82 = tpu.matmul %80, %81, %cst_32 {dimension_numbers = #tpu.dot_dimension_numbers<[1], [0], [0], [1], [0, 0, 1, 1], [], []>} : vector<8x128xf32>, vector<128x128xf32>, vector<8x128xf32> -> vector<8x128xf32>
    %83 = vector.broadcast %8 : vector<1x128xf32> to vector<8x128xf32>
    %84 = arith.addf %82, %83 : vector<8x128xf32>
    %85 = arith.negf %84 : vector<8x128xf32>
    %86 = math.exp %85 : vector<8x128xf32>
    %cst_33 = arith.constant 1.000000e+00 : f32
    %87 = vector.broadcast %cst_33 : f32 to vector<8x128xf32>
    %88 = arith.addf %87, %86 : vector<8x128xf32>
    %89 = arith.divf %87, %88 : vector<8x128xf32>
    %90 = arith.mulf %84, %89 : vector<8x128xf32>
    %91 = arith.mulf %90, %50 : vector<8x128xf32>
    %92 = vector.broadcast %9 : vector<1x128xf32> to vector<8x128xf32>
    %93 = arith.mulf %91, %92 : vector<8x128xf32>
    %cst_34 = arith.constant dense<0.000000e+00> : vector<8xf32>
    %94 = vector.multi_reduction <add>, %93, %cst_34 [1] : vector<8x128xf32> to vector<8xf32>
    %95 = vector.shape_cast %94 : vector<8xf32> to vector<8x1xf32>
    %96 = vector.broadcast %11 : vector<1x1xf32> to vector<8x1xf32>
    %97 = arith.addf %95, %96 : vector<8x1xf32>
    %c0_35 = arith.constant 0 : index
    %c0_36 = arith.constant 0 : index
    %98 = vector.load %arg5[%c0_35, %c0_36] : memref<8x1xf32, #tpu.memory_space<vmem>>, vector<8x1xf32>
    tpu.vector_store %arg5[%c0_35, %c0_36], %97 {strides = array<i32>} : memref<8x1xf32, #tpu.memory_space<vmem>>, vector<8x1xf32>,
    return
  }
  func.func @transform_0(%arg0: i32) -> (i32, i32) {
    %c0_i32 = arith.constant 0 : i32
    %c0_i32_0 = arith.constant 0 : i32
    return %arg0, %c0_i32 : i32, i32
  }
  func.func @transform_1(%arg0: i32) -> (i32, i32) {
    %c0_i32 = arith.constant 0 : i32
    %c0_i32_0 = arith.constant 0 : i32
    return %arg0, %c0_i32 : i32, i32
  }
  func.func @transform_2(%arg0: i32) -> (i32, i32) {
    %c0_i32 = arith.constant 0 : i32
    %c0_i32_0 = arith.constant 0 : i32
    %c0_i32_1 = arith.constant 0 : i32
    return %c0_i32, %c0_i32_0 : i32, i32
  }
  func.func @transform_3(%arg0: i32) -> (i32, i32) {
    %c0_i32 = arith.constant 0 : i32
    %c0_i32_0 = arith.constant 0 : i32
    %c0_i32_1 = arith.constant 0 : i32
    return %c0_i32, %c0_i32_0 : i32, i32
  }
  func.func @transform_4(%arg0: i32) -> (i32, i32) {
    %c0_i32 = arith.constant 0 : i32
    %c0_i32_0 = arith.constant 0 : i32
    return %arg0, %c0_i32 : i32, i32
  }
}

</mosaic_0001>

<bundles_post_ra>
// kernel: tpu_custom_call.1
= control target key start
LH: loop header
LB: loop body
LE: loop exit
PB: predicated region body
PF: predicated region fallthrough
CT: control target
= control target key end

     0   :  { %9 = vsyncpa [#allocation3], 0  ;;  %s1438_s15 = smov [#allocation2]   ;;  %s1619_s0 = inlined_call_operand.vmem [shape: f32[8,1], index: 0, kind: input, shape index: {}]   ;;  %s1620_s1 = inlined_call_operand.vmem [shape: f32[8,2], index: 1, kind: input, shape index: {}]   ;;  %s1621_s2 = inlined_call_operand.hbm [shape: f32[128,896], index: 2, kind: input, shape index: {}]   ;;  %s1622_s3 = inlined_call_operand.vmem [shape: f32[1,1664], index: 3, kind: input, shape index: {}]   ;;  %s1623_s4 = inlined_call_operand.vmem [shape: f32[8,1], index: 4, kind: output, shape index: {}]  }
   0x1   :  { %s19_s16 = sshll.u32 %s1438_s15, 4  ;;  %s1414_s19 = scalar_lea.hbm %s1621_s2, 14336  ;;  %s20_s16 = int_to_ptr.vmem [resolvable:$true] %s19_s16 }
   0x2   :  { %p1415_p0 = scmp.ne.s32.totalorder %s1621_s2, %s1414_s19  ;;  %p1418_p1 = scmp.lt.u32.totalorder %s1414_s19, %s1621_s2 }
   0x4   :  { %p1420_p2 = pnand %p1418_p1, %p1415_p0 }
   0x6   :  { %1423 = shalt.err (!%p1420_p2)
}
   0x7   :  { %s1424_s24 = scalar_lea.vmem %s20_s16, 14336  ;;  %p1429_p4 = scmp.lt.s32.totalorder %s20_s16, %s20_s16 }
   0x8   :  { %p1425_p3 = scmp.ne.s32.totalorder %s20_s16, %s1424_s24  ;;  %p1430_p5 = scmp.lt.s32.totalorder %s1424_s24, %s1424_s24 }
   0xa   :  { %p1431_p6 = por %p1430_p5, %p1429_p4 }
   0xc   :  { %p1432_p7 = pnand %p1431_p6, %p1425_p3 }
   0xe   :  { %1435 = shalt.err (!%p1432_p7)
}
   0xf   :  { %s1439_s25 = smov 896   ;;  %s1440_s26 = smov 56  }
  0x10   :  { %25 = dma.hbm_to_vmem [thread:$0]  %s1621_s2, 14336, %s20_s16, [#allocation3], %s1439_s25, %s1439_s25, %s1440_s26  }
  0x11   :  { %1436 = dma.done.wait [#allocation3], 14336  }
  0x12   :  { %1437 = vsyncadd [#allocation3], 4294952960  ;;  %v1441_v0 = vmov 0   ;;  %v1442_v1 = vmov 1   ;;  %v42_v2 = vld [vmem:[%s1619_s0] sm:$0xff]  ;;  %v268_v4 = vld [vmem:[#allocation2] sm:$0xff] }
  0x13   :  { %1387 = vset.pattern.permute.xlu0 %v1441_v0  ;;  %1388 = vset.pattern.permute.xlu1 %v1442_v1  ;;  %v671_v3 = vld [vmem:[%s1620_s1] sm:$0xff]  ;;  %v269_v5 = vld [vmem:[#allocation2 + $0x38] sm:$0xff]  ;;  %v1443_v7 = vmov 0.0|0.0   ;;  %v271_v9 = vld [vmem:[#allocation2 + $0xa8] sm:$0xff]  ;;  %vm1444_vm0 = vmmov 0   ;;  %v1445_v22 = vmov 0.0  }
  0x14   :  { %45 = vperm.xlu0 %1387, %v42_v2   ;;  %685 = vperm.xlu1 %1388, %v671_v3   ;;  %v1218_v6 = vpack.c.bf16 %v269_v5, %v268_v4  ;;  %v270_v8 = vld [vmem:[#allocation2 + $0x70] sm:$0xff]  ;;  %v272_v11 = vld [vmem:[#allocation2 + $0xe0] sm:$0xff]  ;;  %v273_v12 = vld [vmem:[#allocation2 + $0x118] sm:$0xff]  ;;  %v1446_v43 = vmov 683565275  }
  0x15   :  { %1217 = vmatprep.subr.bf16.mxu0 %v1443_v7  ;;  %1241 = vmatprep.subr.bf16.mxu1 %v1443_v7  ;;  %v1221_v10 = vpack.c.bf16 %v271_v9, %v270_v8  ;;  %v1224_v13 = vpack.c.bf16 %v273_v12, %v272_v11  ;;  %v274_v14 = vld [vmem:[#allocation2 + $0x150] sm:$0xff]  ;;  %v275_v15 = vld [vmem:[#allocation2 + $0x188] sm:$0xff]  ;;  %v276_v17 = vld [vmem:[#allocation2 + $0x1c0] sm:$0xff]  ;;  %v1447_v45 = vmov 2475754826  }
  0x16   :  { %1219 = vmatpush3.bf16.msra.mxu0 %v1218_v6  ;;  %v1227_v16 = vpack.c.bf16 %v275_v15, %v274_v14  ;;  %v277_v18 = vld [vmem:[#allocation2 + $0x1f8] sm:$0xff]  ;;  %v278_v19 = vld [vmem:[#allocation2 + $0x230] sm:$0xff]  ;;  %v279_v21 = vld [vmem:[#allocation2 + $0x268] sm:$0xff]  ;;  %1074 = vmatprep.mubr.msk.f32.mxu0 %vm1444_vm0, %v1445_v22  ;;  %v1448_v48 = vmov 2131351028  }
  0x17   :  { %1220 = vmatprep.subr.bf16.mxu0 %v1443_v7  ;;  %v1230_v20 = vpack.c.bf16 %v277_v18, %v276_v17  ;;  %1109 = vmatprep.mubr.msk.f32.mxu1 %vm1444_vm0, %v1445_v22  ;;  %v1233_v23 = vpack.c.bf16 %v279_v21, %v278_v19  ;;  %v280_v24 = vld [vmem:[#allocation2 + $0x2a0] sm:$0xff]  ;;  %v281_v25 = vld [vmem:[#allocation2 + $0x2d8] sm:$0xff]  ;;  %v282_v27 = vld [vmem:[#allocation2 + $0x310] sm:$0xff]  ;;  %v1449_v51 = vmov 2102212464  }
  0x18   :  { %674 = vperm.xlu0 %1387, %v671_v3   ;;  %v1236_v26 = vpack.c.bf16 %v281_v25, %v280_v24  ;;  %v283_v28 = vld [vmem:[#allocation2 + $0x348] sm:$0xff]  ;;  %v934_v30 = vld [vmem:[%s1622_s3] ss:$0 sm:$0xff]  ;;  %v1450_v54 = vmov 920167782  }
  0x19   :  { %v1239_v29 = vpack.c.bf16 %v283_v28, %v282_v27  ;;  %v1451_v57 = vmov 1326507024  }
  0x1a   :  { %1222 = vmatpush3.bf16.msra.mxu0 %v1221_v10 }
  0x1b   :  { %1223 = vmatprep.subr.bf16.mxu0 %v1443_v7 }
  0x1c   :  { %1389 = vset.pattern.permute.xlu0 %v1442_v1 }
  0x1e   :  { %1225 = vmatpush3.bf16.msra.mxu0 %v1224_v13 }
  0x1f   :  { %1226 = vmatprep.subr.bf16.mxu0 %v1443_v7 }
  0x22   :  { %1228 = vmatpush3.bf16.msra.mxu0 %v1227_v16 }
  0x23   :  { %1229 = vmatprep.subr.bf16.mxu0 %v1443_v7 }
  0x26   :  { %1231 = vmatpush3.bf16.msra.mxu0 %v1230_v20 }
  0x27   :  { %1232 = vmatprep.subr.bf16.mxu0 %v1443_v7 }
  0x2a   :  { %1234 = vmatpush3.bf16.msra.mxu0 %v1233_v23 }
  0x2b   :  { %1235 = vmatprep.subr.bf16.mxu0 %v1443_v7 }
  0x2e   :  { %1237 = vmatpush3.bf16.msra.mxu0 %v1236_v26 }
  0x2f   :  { %1238 = vmatprep.subr.bf16.mxu0 %v1443_v7 }
  0x32   :  { %1240 = vmatpush3.bf16.msra.mxu0 %v1239_v29 }
  0x93   :  { %v46_v31 = vpop.permute.xlu0 %45 }
  0x94   :  { %v1511_v32 = vmul.f32 %v934_v30, %v46_v31 }
  0x96   :  { %v61_v33 = vand.u32 2139095040, %v1511_v32  ;;  %v58_v37 = vand.u32 2147483647, %v1511_v32  ;;  %vm60_vm8 = vcmp.lt.s32.totalorder %v1511_v32, 0 }
  0x98   :  { %v62_v34 = vshrl.u32 %v61_v33, 23  ;;  %v65_v40 = vand.u32 8388607, %v58_v37  ;;  %vm59_vm9 = vcmp.le.f32.partialorder %v58_v37, 0.7853982 }
  0x9a   :  { %v935_v35 = vadd.s32 4294967169, %v62_v34  ;;  %v66_v59 = vor.u32 8388608, %v65_v40 }
  0x9c   :  { %v68_v36 = vadd.s32 1, %v935_v35  ;;  %v106_v10 = vshll.u32 %v66_v59, 8 }
  0x9e   :  { %vm69_vm1 = vcmp.gt.s32.totalorder %v68_v36, 0 }
  0x9f   :  { %v70_v38 = vsel %vm69_vm1, %v68_v36, 0 }
  0xa0   :  { %v72_v39 = vand.u32 31, %v70_v38  ;;  %v71_v42 = vshrl.u32 %v70_v38, 5 }
  0xa2   :  { %v73_v41 = vsub.s32 32, %v72_v39  ;;  %v75_v44 = vshll.u32 %v1446_v43, %v72_v39  ;;  %v78_v46 = vshll.u32 %v1447_v45, %v72_v39  ;;  %v81_v50 = vshll.u32 %v1448_v48, %v72_v39 }
  0xa3   :  { %v84_v53 = vshll.u32 %v1449_v51, %v72_v39  ;;  %v87_v56 = vshll.u32 %v1450_v54, %v72_v39  ;;  %vm90_vm2 = vcmp.lt.s32.totalorder %v71_v42, 1  ;;  %vm93_vm3 = vcmp.lt.s32.totalorder %v71_v42, 4 }
  0xa4   :  { %v76_v47 = vshrl.u32 %v1447_v45, %v73_v41  ;;  %v79_v49 = vshrl.u32 %v1448_v48, %v73_v41  ;;  %v82_v52 = vshrl.u32 %v1449_v51, %v73_v41  ;;  %v85_v55 = vshrl.u32 %v1450_v54, %v73_v41 }
  0xa5   :  { %v88_v58 = vshrl.u32 %v1451_v57, %v73_v41  ;;  %v74_v4 = vshrl.u32 %v1446_v43, %v73_v41  ;;  %vm92_vm4 = vcmp.lt.s32.totalorder %v71_v42, 3  ;;  %vm91_vm5 = vcmp.lt.s32.totalorder %v71_v42, 2 }
  0xa6   :  { %v77_v60 = vor.u32 %v76_v47, %v75_v44  ;;  %v80_v61 = vor.u32 %v79_v49, %v78_v46  ;;  %v83_v62 = vor.u32 %v82_v52, %v81_v50  ;;  %v86_v63 = vor.u32 %v85_v55, %v84_v53 }
  0xa7   :  { %v89_v0 = vor.u32 %v88_v58, %v87_v56  ;;  %v55_v54 = vlaneseq }
  0xa8   :  { %v95_v1 = vsel %vm93_vm3, %v83_v62, 2102212464  ;;  %v98_v2 = vsel %vm90_vm2, %v77_v60, %v80_v61  ;;  %v102_v3 = vsel %vm90_vm2, %v80_v61, %v83_v62  ;;  %v99_v5 = vsel %vm93_vm3, %v86_v63, 920167782 }
  0xa9   :  { %v103_v6 = vsel %vm93_vm3, %v89_v0, 1326507024  ;;  %v100_v8 = vsel %vm92_vm4, %v83_v62, %v99_v5  ;;  %v94_v11 = vsel %vm90_vm2, %v74_v4, %v77_v60  ;;  %v96_v12 = vsel %vm92_vm4, %v80_v61, %v95_v1 }
  0xaa   :  { %v104_v9 = vsel %vm92_vm4, %v86_v63, %v103_v6  ;;  %v101_v13 = vsel %vm91_vm5, %v98_v2, %v100_v8  ;;  %v97_v19 = vsel %vm91_vm5, %v94_v11, %v96_v12  ;;  %v56_v56 = vand.u32 127, %v55_v54  ;;  %v367_v8 = vld [vmem:[#allocation2 + $0x8] sm:$0xff]  ;;  %v369_v11 = vld [vmem:[#allocation2 + $0x78] sm:$0xff]  ;;  %v370_v12 = vld [vmem:[#allocation2 + $0xb0] sm:$0xff] }
  0xab   :  { %v105_v14 = vsel %vm91_vm5, %v102_v3, %v104_v9  ;;  %v1520_v17 = vmul.u32.u64.low %v106_v10, %v101_v13  ;;  %v1521_v18 = vmul.u32.u64.high %v106_v10, %v101_v13, %v1520_v17  ;;  %v113_v21 = vmul.u32 %v106_v10, %v97_v19  ;;  %v368_v9 = vld [vmem:[#allocation2 + $0x40] sm:$0xff]  ;;  %v375_v19 = vld [vmem:[#allocation2 + $0x1c8] sm:$0xff] }
  0xac   :  { %v1517_v15 = vmul.u32.u64.low %v106_v10, %v105_v14  ;;  %v1518_v16 = vmul.u32.u64.high %v106_v10, %v105_v14, %v1517_v15  ;;  %vm57_vm10 = vcmp.lt.s32.totalorder %v56_v56, 64  ;;  %vm150_vm2 = vweird.f32 %v1511_v32  ;;  %v372_v14 = vld [vmem:[#allocation2 + $0x120] sm:$0xff] }
  0xad   :  { %v116_v20 = vadd.s32 1, %v1521_v18  ;;  %v1242_v10 = vpack.c.bf16 %v368_v9, %v367_v8  ;;  %v1245_v13 = vpack.c.bf16 %v370_v12, %v369_v11  ;;  %v472_v56 = vld [vmem:[#allocation2 + $0x80] sm:$0xff]  ;;  %v487_v11 = vld [vmem:[#allocation2 + $0x198] sm:$0xff]  ;;  %v486_v12 = vld [vmem:[#allocation2 + $0x170] sm:$0xff] }
  0xae   :  { %vm115_vm6 = vc.u32 %v1518_v16, %v1520_v17  ;;  %v114_v35 = vadd.s32 %v1520_v17, %v1518_v16  ;;  %v373_v16 = vld [vmem:[#allocation2 + $0x158] sm:$0xff]  ;;  %v374_v17 = vld [vmem:[#allocation2 + $0x190] sm:$0xff]  ;;  %v488_v8 = vld [vmem:[#allocation2 + $0x1a0] sm:$0xff] }
  0xaf   :  { %v117_v23 = vsel %vm115_vm6, %v116_v20, %v1521_v18  ;;  %1243 = vmatpush3.bf16.msra.mxu1 %v1242_v10  ;;  %v1251_v18 = vpack.c.bf16 %v374_v17, %v373_v16  ;;  %v376_v20 = vld [vmem:[#allocation2 + $0x200] sm:$0xff]  ;;  %v494_v16 = vld [vmem:[#allocation2 + $0x210] sm:$0xff] }
  0xb0   :  { %v118_v24 = vadd.s32 %v117_v23, %v113_v21  ;;  %1244 = vmatprep.subr.bf16.mxu1 %v1443_v7  ;;  %v1254_v21 = vpack.c.bf16 %v376_v20, %v375_v19  ;;  %v377_v23 = vld [vmem:[#allocation2 + $0x238] sm:$0xff]  ;;  %v484_v10 = vld [vmem:[#allocation2 + $0x160] sm:$0xff]  ;;  %v493_v19 = vld [vmem:[#allocation2 + $0x208] sm:$0xff] }
  0xb1   :  { %v492_v20 = vld [vmem:[#allocation2 + $0x1e0] sm:$0xff] }
  0xb2   :  { %v119_v25 = vadd.s32 536870912, %v118_v24 }
  0xb3   :  { %1246 = vmatpush3.bf16.msra.mxu1 %v1245_v13  ;;  %v1279_v13 = vpack.c.bf16 %v487_v11, %v484_v10  ;;  %v719_v11 = vld [vmem:[#allocation2 + $0x1e8] sm:$0xff] }
  0xb4   :  { %v120_v26 = vshrl.u32 %v119_v25, 30  ;;  %1247 = vmatprep.subr.bf16.mxu1 %v1443_v7 }
  0xb6   :  { %v121_v27 = vshll.u32 %v120_v26, 30  ;;  %v144_v48 = vsub.s32 4, %v120_v26 }
  0xb8   :  { %v122_v28 = vsub.s32 %v118_v24, %v121_v27  ;;  %v145_v51 = vsel %vm60_vm8, %v144_v48, %v120_v26  ;;  %v378_v24 = vld [vmem:[#allocation2 + $0x270] sm:$0xff]  ;;  %v379_v26 = vld [vmem:[#allocation2 + $0x2a8] sm:$0xff]  ;;  %v380_v27 = vld [vmem:[#allocation2 + $0x2e0] sm:$0xff] }
  0xb9   :  { %v147_v53 = vsel %vm59_vm9, 0, %v145_v51  ;;  %v1257_v25 = vpack.c.bf16 %v378_v24, %v377_v23  ;;  %v468_v48 = vld [vmem:[#allocation2 + $0x20] sm:$0xff]  ;;  %v495_v23 = vld [vmem:[#allocation2 + $0x218] sm:$0xff] }
  0xba   :  { %v124_v29 = vsub.s32 0, %v122_v28  ;;  %v151_v55 = vadd.s32 3, %v147_v53  ;;  %v255_v58 = vand.u32 3, %v147_v53  ;;  %v476_v53 = vld [vmem:[#allocation2 + $0xc0] sm:$0xff]  ;;  %v1310_v24 = vpack.c.bf16 %v495_v23, %v492_v20  ;;  %v726_v20 = vld [vmem:[#allocation2 + $0x370] sm:$0xff] }
  0xbb   :  { %v1572_v23 = vshrl.u32 %v55_v54, 7 }
  0xbc   :  { %v936_v30 = vmin.u32 %v124_v29, %v122_v28  ;;  %v152_v57 = vand.u32 3, %v151_v55  ;;  %vm260_vm12 = vcmp.eq.s32.totalorder %v255_v58, 2  ;;  %vm257_vm14 = vcmp.eq.s32.totalorder %v255_v58, 0  ;;  %v381_v29 = vld [vmem:[#allocation2 + $0x318] sm:$0xff] }
  0xbd   :  { %vm256_vm1 = vcmp.lt.s32.totalorder %v255_v58, 2  ;;  %v474_v58 = vld [vmem:[#allocation2 + $0x90] sm:$0xff] }
  0xbe   :  { %v126_v31 = vclz %v936_v30  ;;  %vm157_vm11 = vcmp.eq.s32.totalorder %v152_v57, 2  ;;  %vm154_vm13 = vcmp.eq.s32.totalorder %v152_v57, 0  ;;  %vm153_vm15 = vcmp.lt.s32.totalorder %v152_v57, 2  ;;  %v382_v30 = vld [vmem:[#allocation2 + $0x350] sm:$0xff]  ;;  %v475_v57 = vld [vmem:[#allocation2 + $0xb8] sm:$0xff] }
  0xc0   :  { %v937_v33 = vadd.s32 4294967294, %v126_v31  ;;  %v1263_v31 = vpack.c.bf16 %v382_v30, %v381_v29  ;;  %v499_v29 = vld [vmem:[#allocation2 + $0x278] sm:$0xff]  ;;  %v498_v30 = vld [vmem:[#allocation2 + $0x250] sm:$0xff] }
  0xc2   :  { %vm938_vm7 = vcmp.lt.s32.totalorder %v937_v33, 0 }
  0xc3   :  { %v129_v34 = vsel %vm938_vm7, 0, %v937_v33  ;;  %v467_v33 = vld [vmem:[#allocation2 + $0x18] sm:$0xff] }
  0xc4   :  { %v130_v36 = vsub.s32 32, %v129_v34  ;;  %v134_v38 = vsub.s32 4294967266, %v129_v34  ;;  %v131_v39 = vshll.u32 %v122_v28, %v129_v34  ;;  %v1260_v28 = vpack.c.bf16 %v380_v27, %v379_v26  ;;  %v470_v34 = vld [vmem:[#allocation2 + $0x50] sm:$0xff]  ;;  %v500_v26 = vld [vmem:[#allocation2 + $0x280] sm:$0xff] }
  0xc6   :  { %v132_v40 = vshrl.u32 %v114_v35, %v130_v36  ;;  %v135_v41 = vadd.s32 127, %v134_v38  ;;  %v1265_v35 = vpack.c.bf16 %v470_v34, %v467_v33  ;;  %v943_v36 = vld [vmem:[%s1622_s3 + $0x4] ss:$0 sm:$0xff]  ;;  %v501_v33 = vld [vmem:[#allocation2 + $0x288] sm:$0xff] }
  0xc7   :  { %v1313_v34 = vpack.c.bf16 %v501_v33, %v498_v30  ;;  %v517_v30 = vsub.s32 0, %v1572_v23 }
  0xc8   :  { %v133_v42 = vor.u32 %v132_v40, %v131_v39  ;;  %v136_v43 = vshll.u32 %v135_v41, 23  ;;  %1266 = vmatprep.subr.bf16.mxu0 %v1265_v35  ;;  %v503_v35 = vld [vmem:[#allocation2 + $0x2b8] sm:$0xff] }
  0xca   :  { %v137_v44 = vor.u32 4788187, %v136_v43  ;;  %v140_v46 = vcvt.s32.f32 %v133_v42 }
  0xcc   :  { %v138_v45 = vand.u32 2147483647, %v137_v44 }
  0xce   :  { %v141_v47 = vmul.f32 %v140_v46, %v138_v45  ;;  %v466_v46 = vld [vmem:[#allocation2 + $0x10] sm:$0xff] }
  0xd0   :  { %v142_v49 = vxor.u32 2147483648, %v141_v47 }
  0xd2   :  { %v143_v50 = vsel %vm60_vm8, %v142_v49, %v141_v47  ;;  %v469_v47 = vld [vmem:[#allocation2 + $0x48] sm:$0xff] }
  0xd3   :  { %v146_v52 = vsel %vm59_vm9, %v1511_v32, %v143_v50  ;;  %v371_v32 = vld [vmem:[#allocation2 + $0xe8] sm:$0xff]  ;;  %v1267_v49 = vpack.c.bf16 %v469_v47, %v466_v46  ;;  %v471_v50 = vld [vmem:[#allocation2 + $0x58] sm:$0xff]  ;;  %v512_v46 = vld [vmem:[#allocation2 + $0x360] sm:$0xff] }
  0xd4   :  { %1390 = vcosq.f32 %v146_v52  ;;  %v1248_v15 = vpack.c.bf16 %v372_v14, %v371_v32  ;;  %v1298_v51 = vpack.c.bf16 %v471_v50, %v468_v48  ;;  %v489_v32 = vld [vmem:[#allocation2 + $0x1a8] sm:$0xff]  ;;  %v508_v48 = vld [vmem:[#allocation2 + $0x320] sm:$0xff]  ;;  %v510_v50 = vld [vmem:[#allocation2 + $0x330] sm:$0xff] }
  0xd5   :  { %1392 = vsinq.f32 %v146_v52  ;;  %v473_v52 = vld [vmem:[#allocation2 + $0x88] sm:$0xff]  ;;  %v1307_v14 = vpack.c.bf16 %v489_v32, %v486_v12  ;;  %v720_v12 = vld [vmem:[#allocation2 + $0x220] sm:$0xff]  ;;  %v721_v32 = vld [vmem:[#allocation2 + $0x258] sm:$0xff] }
  0xd6   :  { %1249 = vmatpush3.bf16.msra.mxu1 %v1248_v15  ;;  %v1269_v55 = vpack.c.bf16 %v476_v53, %v473_v52  ;;  %v491_v15 = vld [vmem:[#allocation2 + $0x1d8] sm:$0xff]  ;;  %v513_v52 = vld [vmem:[#allocation2 + $0x368] sm:$0xff] }
  0xd7   :  { %1250 = vmatprep.subr.bf16.mxu1 %v1443_v7  ;;  %v1281_v17 = vpack.c.bf16 %v494_v16, %v491_v15  ;;  %v1319_v53 = vpack.c.bf16 %v513_v52, %v510_v50  ;;  %v723_v16 = vld [vmem:[#allocation2 + $0x2c8] sm:$0xff]  ;;  %v814_v52 = vld [vmem:[#allocation2 + $0xd8] sm:$0xff] }
  0xda   :  { %1252 = vmatpush3.bf16.msra.mxu1 %v1251_v18  ;;  %v490_v18 = vld [vmem:[#allocation2 + $0x1d0] sm:$0xff] }
  0xdb   :  { %1253 = vmatprep.subr.bf16.mxu1 %v1443_v7 }
  0xde   :  { %v1391_v59 = vpop.eup %1390  ;;  %1255 = vmatpush3.bf16.msra.mxu1 %v1254_v21  ;;  %v1283_v21 = vpack.c.bf16 %v493_v19, %v490_v18  ;;  %v725_v19 = vld [vmem:[#allocation2 + $0x338] sm:$0xff] }
  0xdf   :  { %v1393_v60 = vpop.eup %1392  ;;  %v158_v61 = vxor.u32 2147483648, %v1391_v59  ;;  %1256 = vmatprep.subr.bf16.mxu1 %v1443_v7 }
  0xe0   :  { %v155_v62 = vxor.u32 2147483648, %v1393_v60 }
  0xe1   :  { %v159_v37 = vsel %vm157_vm11, %v158_v61, %v1393_v60  ;;  %v262_v63 = vsel %vm260_vm12, %v158_v61, %v1393_v60  ;;  %v477_v60 = vld [vmem:[#allocation2 + $0xc8] sm:$0xff] }
  0xe2   :  { %v156_v0 = vsel %vm154_vm13, %v1391_v59, %v155_v62  ;;  %v259_v1 = vsel %vm257_vm14, %v1391_v59, %v155_v62  ;;  %1258 = vmatpush3.bf16.msra.mxu1 %v1257_v25  ;;  %v1271_v59 = vpack.c.bf16 %v475_v57, %v472_v56  ;;  %v1301_v61 = vpack.c.bf16 %v477_v60, %v474_v58  ;;  %v479_v62 = vld [vmem:[#allocation2 + $0xf8] sm:$0xff]  ;;  %v497_v25 = vld [vmem:[#allocation2 + $0x248] sm:$0xff] }
  0xe3   :  { %v160_v2 = vsel %vm153_vm15, %v156_v0, %v159_v37  ;;  %v263_v3 = vsel %vm256_vm1, %v259_v1, %v262_v63  ;;  %1259 = vmatprep.subr.bf16.mxu1 %v1443_v7  ;;  %v482_v37 = vld [vmem:[#allocation2 + $0x130] sm:$0xff]  ;;  %v481_v1 = vld [vmem:[#allocation2 + $0x128] sm:$0xff]  ;;  %v1285_v27 = vpack.c.bf16 %v500_v26, %v497_v25  ;;  %v675_v26 = vpop.permute.xlu0 %674 }
  0xe4   :  { %v161_v4 = vsel %vm150_vm2, nan, %v160_v2  ;;  %v264_v5 = vsel %vm150_vm2, nan, %v263_v3  ;;  %v1273_v63 = vpack.c.bf16 %v482_v37, %v479_v62  ;;  %v478_v0 = vld [vmem:[#allocation2 + $0xf0] sm:$0xff]  ;;  %v480_v2 = vld [vmem:[#allocation2 + $0x100] sm:$0xff] }
  0xe5   :  { %v267_v6 = vsel %vm57_vm10, %v161_v4, %v264_v5  ;;  %v1275_v3 = vpack.c.bf16 %v481_v1, %v478_v0  ;;  %v483_v4 = vld [vmem:[#allocation2 + $0x138] sm:$0xff]  ;;  %v712_v0 = vld [vmem:[#allocation2 + $0x60] sm:$0xff]  ;;  %v948_v25 = vld [vmem:[%s1622_s3 + $0x2] ss:$0 sm:$0xff] }
  0xe6   :  { %1075 = vmatmul.mubr.f32.vlgmr.msra.gmra.mrb[0].mxu0 %v267_v6  ;;  %1261 = vmatpush3.bf16.msra.mxu1 %v1260_v28  ;;  %v1304_v5 = vpack.c.bf16 %v483_v4, %v480_v2  ;;  %v485_v6 = vld [vmem:[#allocation2 + $0x168] sm:$0xff]  ;;  %v496_v28 = vld [vmem:[#allocation2 + $0x240] sm:$0xff]  ;;  %v713_v2 = vld [vmem:[#allocation2 + $0x98] sm:$0xff] }
  0xe7   :  { %594 = vmatprep.mubr.f32.mxu0 %v1445_v22  ;;  %1262 = vmatprep.subr.bf16.mxu1 %v1443_v7  ;;  %v1277_v9 = vpack.c.bf16 %v488_v8, %v485_v6  ;;  %v716_v6 = vld [vmem:[#allocation2 + $0x140] sm:$0xff] }
  0xe8   :  { %1268 = vmatpush1.bf16.msra.mxu0 %v1267_v49  ;;  %v511_v49 = vld [vmem:[#allocation2 + $0x358] sm:$0xff] }
  0xe9   :  { %1270 = vmatprep.subr.bf16.mxu0 %v1269_v55  ;;  %v945_v55 = vld [vmem:[%s1622_s3 + $0x5] ss:$0 sm:$0xff] }
  0xea   :  { %1264 = vmatpush3.bf16.msra.mxu1 %v1263_v31  ;;  %v1287_v31 = vpack.c.bf16 %v499_v29, %v496_v28 }
  0xeb   :  { %1297 = vmatprep.subr.bf16.mxu1 %v1443_v7 }
  0xec   :  { %1272 = vmatpush1.bf16.msra.mxu0 %v1271_v59 }
  0xed   :  { %1274 = vmatprep.subr.bf16.mxu0 %v1273_v63  ;;  %v711_v63 = vld [vmem:[#allocation2 + $0x28] sm:$0xff] }
  0xee   :  { %v1322_v1 = vpack.c.bf16 %v712_v0, %v711_v63  ;;  %v821_v63 = vld [vmem:[#allocation2 + $0x260] sm:$0xff]  ;;  %v822_v0 = vld [vmem:[#allocation2 + $0x298] sm:$0xff] }
  0xf0   :  { %1276 = vmatpush1.bf16.msra.mxu0 %v1275_v3  ;;  %v714_v3 = vld [vmem:[#allocation2 + $0xd0] sm:$0xff] }
  0xf1   :  { %1278 = vmatprep.subr.bf16.mxu0 %v1277_v9  ;;  %v1325_v4 = vpack.c.bf16 %v714_v3, %v713_v2  ;;  %v717_v9 = vld [vmem:[#allocation2 + $0x178] sm:$0xff]  ;;  %v823_v2 = vld [vmem:[#allocation2 + $0x2d0] sm:$0xff]  ;;  %v824_v3 = vld [vmem:[#allocation2 + $0x308] sm:$0xff] }
  0xf4   :  { %1280 = vmatpush1.bf16.msra.mxu0 %v1279_v13  ;;  %v1334_v13 = vpack.c.bf16 %v720_v12, %v719_v11 }
  0xf5   :  { %1282 = vmatprep.subr.bf16.mxu0 %v1281_v17  ;;  %v724_v17 = vld [vmem:[#allocation2 + $0x300] sm:$0xff] }
  0xf6   :  { %v1340_v18 = vpack.c.bf16 %v724_v17, %v723_v16 }
  0xf8   :  { %1284 = vmatpush1.bf16.msra.mxu0 %v1283_v21  ;;  %v1343_v21 = vpack.c.bf16 %v726_v20, %v725_v19  ;;  %v953_v19 = vld [vmem:[%s1622_s3 + $0xa] ss:$0 sm:$0xff] }
  0xf9   :  { %1286 = vmatprep.subr.bf16.mxu0 %v1285_v27  ;;  %v947_v27 = vld [vmem:[%s1622_s3 + $0x1] ss:$0 sm:$0xff] }
  0xfa   :  { %v683_v29 = vmul.f32 %v947_v27, %v675_v26 }
  0xfc   :  { %1288 = vmatpush1.bf16.msra.mxu0 %v1287_v31  ;;  %v1584_v31 = vld [vmem:[%s1622_s3 + $0x6] sm:$0x7] }
  0xfd   :  { %v518_v33 = vrot.slane %v1584_v31, %v517_v30 }
 0x1b9   :  { %v356_v38 = vpop.f32.mrb[0].mxu0 }
 0x1ba   :  { %v357_v39 = vadd.f32 %v943_v36, %v356_v38  ;;  %v1076_v40 = vpop.f32.mrb[1].mxu0  ;;  %v506_v36 = vld [vmem:[#allocation2 + $0x2f0] sm:$0xff] }
 0x1bb   :  { %v1289_v38 = vpack.c.bf16 %v506_v36, %v503_v35  ;;  %v505_v40 = vld [vmem:[#allocation2 + $0x2e8] sm:$0xff] }
 0x1bc   :  { %v944_v41 = vmul.f32 -1.442695, %v357_v39 }
 0x1bd   :  { %1290 = vmatprep.subr.bf16.mxu0 %v1289_v38 }
 0x1be   :  { %1394 = vpow2.f32 %v944_v41  ;;  %v504_v41 = vld [vmem:[#allocation2 + $0x2c0] sm:$0xff] }
 0x1c8   :  { %v1395_v42 = vpop.eup %1394 }
 0x1c9   :  { %v363_v43 = vadd.f32 1.0, %v1395_v42 }
 0x1cb   :  { %1396 = vrcp.f32 %v363_v43  ;;  %v507_v43 = vld [vmem:[#allocation2 + $0x2f8] sm:$0xff] }
 0x1d5   :  { %v1397_v44 = vpop.eup %1396 }
 0x1d6   :  { %v366_v45 = vmul.f32 %v1397_v44, %v357_v39  ;;  %v502_v39 = vld [vmem:[#allocation2 + $0x2b0] sm:$0xff]  ;;  %v1316_v44 = vpack.c.bf16 %v507_v43, %v504_v41 }
 0x1d7   :  { %v1291_v42 = vpack.c.bf16 %v505_v40, %v502_v39 }
 0x1d8   :  { %1110 = vmatmul.mubr.f32.vlgmr.msra.gmra.mrb[0].mxu1 %v366_v45  ;;  %v509_v45 = vld [vmem:[#allocation2 + $0x328] sm:$0xff] }
 0x1d9   :  { %1144 = vmatprep.mubr.msk.f32.mxu1 %vm1444_vm0, %v1445_v22  ;;  %1299 = vmatpush3.bf16.msra.mxu1 %v1298_v51  ;;  %v1293_v47 = vpack.c.bf16 %v512_v46, %v509_v45  ;;  %v1295_v51 = vpack.c.bf16 %v511_v49, %v508_v48  ;;  %v811_v48 = vld [vmem:[#allocation2 + $0x30] sm:$0xff]  ;;  %v812_v49 = vld [vmem:[#allocation2 + $0x68] sm:$0xff] }
 0x1da   :  { %1300 = vmatprep.subr.bf16.mxu1 %v1443_v7  ;;  %1292 = vmatpush1.bf16.msra.mxu0 %v1291_v42  ;;  %v1346_v50 = vpack.c.bf16 %v812_v49, %v811_v48 }
 0x1db   :  { %1294 = vmatprep.subr.bf16.mxu0 %v1293_v47 }
 0x1dd   :  { %1302 = vmatpush3.bf16.msra.mxu1 %v1301_v61 }
 0x1de   :  { %1303 = vmatprep.subr.bf16.mxu1 %v1443_v7  ;;  %1296 = vmatpush1.bf16.msra.mxu0 %v1295_v51  ;;  %v813_v51 = vld [vmem:[#allocation2 + $0xa0] sm:$0xff] }
 0x1df   :  { %1321 = vmatprep.subr.bf16.mxu0 %v1443_v7 }
 0x1e1   :  { %1305 = vmatpush3.bf16.msra.mxu1 %v1304_v5  ;;  %v715_v5 = vld [vmem:[#allocation2 + $0x108] sm:$0xff] }
 0x1e2   :  { %1306 = vmatprep.subr.bf16.mxu1 %v1443_v7  ;;  %v1328_v8 = vpack.c.bf16 %v716_v6, %v715_v5  ;;  %v825_v5 = vld [vmem:[#allocation2 + $0x340] sm:$0xff]  ;;  %v826_v6 = vld [vmem:[#allocation2 + $0x378] sm:$0xff] }
 0x1e5   :  { %1308 = vmatpush3.bf16.msra.mxu1 %v1307_v14  ;;  %v722_v14 = vld [vmem:[#allocation2 + $0x290] sm:$0xff] }
 0x1e6   :  { %1309 = vmatprep.subr.bf16.mxu1 %v1443_v7  ;;  %v1337_v15 = vpack.c.bf16 %v722_v14, %v721_v32  ;;  %v521_v14 = vsub.s32 1, %v1572_v23 }
 0x1e9   :  { %1311 = vmatpush3.bf16.msra.mxu1 %v1310_v24  ;;  %v686_v24 = vpop.permute.xlu1 %685 }
 0x1ea   :  { %1312 = vmatprep.subr.bf16.mxu1 %v1443_v7  ;;  %v694_v28 = vmul.f32 %v948_v25, %v686_v24 }
 0x1ec   :  { %v695_v54 = vadd.f32 %v694_v28, %v683_v29  ;;  %v525_v28 = vsub.s32 2, %v1572_v23 }
 0x1ed   :  { %1314 = vmatpush3.bf16.msra.mxu1 %v1313_v34  ;;  %v949_v34 = vld [vmem:[%s1622_s3 + $0x3] ss:$0 sm:$0xff] }
 0x1ee   :  { %1315 = vmatprep.subr.bf16.mxu1 %v1443_v7  ;;  %v702_v39 = vadd.f32 %v949_v34, %v695_v54  ;;  %v526_v29 = vrot.slane %v1584_v31, %v525_v28  ;;  %v955_v34 = vld [vmem:[%s1622_s3 + $0xb] ss:$0 sm:$0xff] }
 0x1f1   :  { %1317 = vmatpush3.bf16.msra.mxu1 %v1316_v44 }
 0x1f2   :  { %1318 = vmatprep.subr.bf16.mxu1 %v1443_v7 }
 0x1f5   :  { %1320 = vmatpush3.bf16.msra.mxu1 %v1319_v53  ;;  %v1349_v53 = vpack.c.bf16 %v814_v52, %v813_v51 }
 0x1f6   :  { %1345 = vmatprep.subr.bf16.mxu1 %v1443_v7 }
 0x2ab   :  { %v455_v56 = vpop.f32.mrb[0].mxu1 }
 0x2ac   :  { %v456_v57 = vadd.f32 %v945_v55, %v455_v56  ;;  %v1111_v58 = vpop.f32.mrb[1].mxu1  ;;  %v815_v55 = vld [vmem:[#allocation2 + $0x110] sm:$0xff]  ;;  %v816_v56 = vld [vmem:[#allocation2 + $0x148] sm:$0xff] }
 0x2ad   :  { %v817_v58 = vld [vmem:[#allocation2 + $0x180] sm:$0xff] }
 0x2ae   :  { %v946_v59 = vmul.f32 -1.442695, %v456_v57 }
 0x2b0   :  { %1398 = vpow2.f32 %v946_v59  ;;  %v818_v59 = vld [vmem:[#allocation2 + $0x1b8] sm:$0xff] }
 0x2ba   :  { %v1399_v60 = vpop.eup %1398 }
 0x2bb   :  { %v462_v61 = vadd.f32 1.0, %v1399_v60  ;;  %v1355_v60 = vpack.c.bf16 %v818_v59, %v817_v58 }
 0x2bd   :  { %1400 = vrcp.f32 %v462_v61  ;;  %v819_v61 = vld [vmem:[#allocation2 + $0x1f0] sm:$0xff] }
 0x2c7   :  { %v1401_v62 = vpop.eup %1400 }
 0x2c8   :  { %v465_v37 = vmul.f32 %v1401_v62, %v456_v57  ;;  %v1352_v57 = vpack.c.bf16 %v816_v56, %v815_v55  ;;  %v820_v62 = vld [vmem:[#allocation2 + $0x228] sm:$0xff] }
 0x2ca   :  { %595 = vmatmul.mubr.f32.vlgmr.msra.gmra.mrb[2].mxu0 %v465_v37  ;;  %1145 = vmatmul.mubr.f32.vlgmr.msra.gmra.mrb[2].mxu1 %v465_v37  ;;  %v1358_v37 = vpack.c.bf16 %v820_v62, %v819_v61 }
 0x2cb   :  { %1179 = vmatprep.mubr.msk.f32.mxu0 %vm1444_vm0, %v1445_v22  ;;  %1214 = vmatprep.mubr.msk.f32.mxu1 %vm1444_vm0, %v1445_v22  ;;  %v718_v22 = vld [vmem:[#allocation2 + $0x1b0] sm:$0xff]  ;;  %vm927_vm0 = vcmask 7168  }
 0x2cc   :  { %1323 = vmatpush3.bf16.msra.mxu0 %v1322_v1  ;;  %v1331_v10 = vpack.c.bf16 %v718_v22, %v717_v9  ;;  %1347 = vmatpush3.bf16.msra.mxu1 %v1346_v50  ;;  %v1361_v1 = vpack.c.bf16 %v822_v0, %v821_v63  ;;  %v951_v9 = vld [vmem:[%s1622_s3 + $0x9] ss:$0 sm:$0xff] }
 0x2cd   :  { %1324 = vmatprep.subr.bf16.mxu0 %v1443_v7  ;;  %1348 = vmatprep.subr.bf16.mxu1 %v1443_v7 }
 0x2d0   :  { %1326 = vmatpush3.bf16.msra.mxu0 %v1325_v4  ;;  %1350 = vmatpush3.bf16.msra.mxu1 %v1349_v53  ;;  %v1364_v4 = vpack.c.bf16 %v824_v3, %v823_v2 }
 0x2d1   :  { %1327 = vmatprep.subr.bf16.mxu0 %v1443_v7  ;;  %1351 = vmatprep.subr.bf16.mxu1 %v1443_v7 }
 0x2d4   :  { %1329 = vmatpush3.bf16.msra.mxu0 %v1328_v8  ;;  %1353 = vmatpush3.bf16.msra.mxu1 %v1352_v57  ;;  %v1367_v8 = vpack.c.bf16 %v826_v6, %v825_v5 }
 0x2d5   :  { %1330 = vmatprep.subr.bf16.mxu0 %v1443_v7  ;;  %1354 = vmatprep.subr.bf16.mxu1 %v1443_v7 }
 0x2d8   :  { %1332 = vmatpush3.bf16.msra.mxu0 %v1331_v10  ;;  %1356 = vmatpush3.bf16.msra.mxu1 %v1355_v60 }
 0x2d9   :  { %1333 = vmatprep.subr.bf16.mxu0 %v1443_v7  ;;  %1357 = vmatprep.subr.bf16.mxu1 %v1443_v7 }
 0x2dc   :  { %1335 = vmatpush3.bf16.msra.mxu0 %v1334_v13  ;;  %1359 = vmatpush3.bf16.msra.mxu1 %v1358_v37 }
 0x2dd   :  { %1336 = vmatprep.subr.bf16.mxu0 %v1443_v7  ;;  %1360 = vmatprep.subr.bf16.mxu1 %v1443_v7 }
 0x2e0   :  { %1338 = vmatpush3.bf16.msra.mxu0 %v1337_v15  ;;  %1362 = vmatpush3.bf16.msra.mxu1 %v1361_v1 }
 0x2e1   :  { %1339 = vmatprep.subr.bf16.mxu0 %v1443_v7  ;;  %1363 = vmatprep.subr.bf16.mxu1 %v1443_v7 }
 0x2e4   :  { %1341 = vmatpush3.bf16.msra.mxu0 %v1340_v18  ;;  %1365 = vmatpush3.bf16.msra.mxu1 %v1364_v4 }
 0x2e5   :  { %1342 = vmatprep.subr.bf16.mxu0 %v1443_v7  ;;  %1366 = vmatprep.subr.bf16.mxu1 %v1443_v7  ;;  %v522_v7 = vrot.slane %v1584_v31, %v521_v14 }
 0x2e8   :  { %1344 = vmatpush3.bf16.msra.mxu0 %v1343_v21  ;;  %1368 = vmatpush3.bf16.msra.mxu1 %v1367_v8 }
 0x39d   :  { %v596_v35 = vpop.f32.mrb[2].mxu0  ;;  %v1590_v36 = vpop.f32.mrb[2].mxu1 }
 0x39e   :  { %v597_v38 = vadd.f32 %v596_v35, %v518_v33  ;;  %v598_v40 = vpop.f32.mrb[3].mxu0  ;;  %v1146_v41 = vpop.f32.mrb[3].mxu1  ;;  %v668_v54 = vadd.f32 %v1590_v36, %v526_v29 }
 0x39f   :  { %v599_v16 = vadd.f32 %v598_v40, %v522_v7 }
 0x3a0   :  { %v703_v42 = vmul.f32 %v702_v39, %v597_v38  ;;  %v956_v39 = vld [vmem:[%s1622_s3 + $0xc] ss:$0 sm:$0xff] }
 0x3a2   :  { %v950_v43 = vmul.f32 -1.442695, %v703_v42 }
 0x3a4   :  { %1402 = vpow2.f32 %v950_v43 }
 0x3ae   :  { %v1403_v44 = vpop.eup %1402 }
 0x3af   :  { %v707_v45 = vadd.f32 1.0, %v1403_v44 }
 0x3b1   :  { %1404 = vrcp.f32 %v707_v45 }
 0x3bb   :  { %v1405_v46 = vpop.eup %1404 }
 0x3bc   :  { %v710_v47 = vmul.f32 %v1405_v46, %v703_v42 }
 0x3be   :  { %1180 = vmatmul.mubr.f32.vlgmr.msra.gmra.mrb[4].mxu0 %v710_v47 }
 0x491   :  { %v799_v22 = vpop.f32.mrb[4].mxu0 }
 0x492   :  { %v800_v10 = vadd.f32 %v951_v9, %v799_v22  ;;  %v1181_v11 = vpop.f32.mrb[5].mxu0 }
 0x494   :  { %v952_v12 = vmul.f32 -1.442695, %v800_v10 }
 0x496   :  { %1406 = vpow2.f32 %v952_v12 }
 0x4a0   :  { %v1407_v13 = vpop.eup %1406 }
 0x4a1   :  { %v806_v32 = vadd.f32 1.0, %v1407_v13 }
 0x4a3   :  { %1408 = vrcp.f32 %v806_v32 }
 0x4ad   :  { %v1409_v15 = vpop.eup %1408 }
 0x4ae   :  { %v809_v17 = vmul.f32 %v1409_v15, %v800_v10 }
 0x4b0   :  { %v810_v18 = vmul.f32 %v809_v17, %v599_v16 }
 0x4b2   :  { %1215 = vmatmul.mubr.f32.vlgmr.msra.gmra.mrb[4].mxu1 %v810_v18 }
 0x585   :  { %v899_v20 = vpop.f32.mrb[4].mxu1 }
 0x586   :  { %v900_v21 = vadd.f32 %v953_v19, %v899_v20  ;;  %v1216_v24 = vpop.f32.mrb[5].mxu1 }
 0x588   :  { %v954_v25 = vmul.f32 -1.442695, %v900_v21 }
 0x58a   :  { %1410 = vpow2.f32 %v954_v25 }
 0x594   :  { %v1411_v26 = vpop.eup %1410 }
 0x595   :  { %v906_v27 = vadd.f32 1.0, %v1411_v26 }
 0x597   :  { %1412 = vrcp.f32 %v906_v27 }
 0x5a1   :  { %v1413_v30 = vpop.eup %1412 }
 0x5a2   :  { %v909_v33 = vmul.f32 %v1413_v30, %v900_v21 }
 0x5a4   :  { %v910_v35 = vmul.f32 %v909_v33, %v668_v54 }
 0x5a6   :  { %v917_v38 = vmul.f32 %v955_v34, %v910_v35 }
 0x5a8   :  { %918 = vadd.xlane.f32.xlu1 %v917_v38 }
 0x635   :  { %v919_v40 = vpop.xlane.xlu1 %918 }
 0x636   :  { %v926_v23 = vadd.f32 %v956_v39, %v919_v40 }
 0x638   :  { %928 = vst.msk [vmem:[%s1623_s4] sm:$0xff] %vm927_vm0, %v926_v23 }
 0x639   :  { %933 = vsyncpa [#allocation3], 1 }

</bundles_post_ra>
